<compile_context>
chip_gen: v7x
topology: tpu7x:2x2x1
jax: 0.10.0
libtpu: 0.0.40
codegen_flags: <defaults>
</compile_context>

<pallas_src>
import functools

import jax
import jax.numpy as jnp
from jax.experimental import pallas as pl
from jax.experimental.pallas import tpu as pltpu


def _soft_bootstrap_kernel(logits_ref, labels_ref, out_ref, *, beta):
    # (TN, C) logits tile; cast to f32 in-kernel (VALU has slack here).
    z = logits_ref[...].astype(jnp.float32)
    labels = labels_ref[...]                                  # (TN, 1) int32
    tn, c = z.shape

    # Numerically stable log-softmax along the class (lane) axis.
    z = z - jnp.max(z, axis=-1, keepdims=True)
    logp = z - jnp.log(jnp.sum(jnp.exp(z), axis=-1, keepdims=True))

    # Cross entropy (reduction='none'): -log p[i, y_i] via masked select.
    col = jax.lax.broadcasted_iota(jnp.int32, (tn, c), 1)
    ce = -jnp.sum(jnp.where(col == labels, logp, 0.0), axis=-1)        # (TN,)

    # Bootstrap term: -sum(softmax * log_softmax, dim=1).
    boot = -jnp.sum(jnp.exp(logp) * logp, axis=-1)                     # (TN,)

    per_sample = beta * ce + (1.0 - beta) * boot                       # (TN,)
    out_ref[...] = per_sample.reshape(1, tn)      # lane-dense (1, TN) store


def _choose_row_tile(n, c, itemsize):
    """Rows per tile: ~2 MiB native-dtype input block, multiple of 128."""
    target_bytes = 2 * 1024 * 1024
    tn = target_bytes // max(1, c * itemsize)
    tn = max(128, min(2048, (tn // 128) * 128))
    # Never tile more rows than exist (rounded up to a lane-dense multiple).
    tn = min(tn, ((n + 127) // 128) * 128)
    return tn


def soft_bootstrapping_loss(y_pred, y, beta=0.95, reduction="mean",
                            as_pseudo_label=True):
    """Forward pass of SoftBootstrappingLoss. y_pred: (N, C) logits, y: (N,)."""
    del as_pseudo_label  # only affects gradients (detach); forward identical
    n, c = y_pred.shape
    itemsize = jnp.dtype(y_pred.dtype).itemsize
    tn = _choose_row_tile(n, c, itemsize)
    num_tiles = pl.cdiv(n, tn)
    n_pad = num_tiles * tn

    if n_pad != n:
        # Zero-padded rows produce finite garbage that is sliced off below.
        y_pred = jnp.pad(y_pred, ((0, n_pad - n), (0, 0)))
        y = jnp.pad(y, (0, n_pad - n))
    labels = y.reshape(n_pad, 1).astype(jnp.int32)

    kernel = functools.partial(_soft_bootstrap_kernel, beta=float(beta))

    per_sample = pl.pallas_call(
        kernel,
        out_shape=jax.ShapeDtypeStruct((1, n_pad), jnp.float32),
        grid=(num_tiles,),
        in_specs=[
            pl.BlockSpec((tn, c), lambda i: (i, 0)),   # native-dtype logits
            pl.BlockSpec((tn, 1), lambda i: (i, 0)),   # int32 labels
        ],
        out_specs=pl.BlockSpec((1, tn), lambda i: (0, i)),
        compiler_params=pltpu.CompilerParams(
            dimension_semantics=("parallel",),
        ),
        cost_estimate=pl.CostEstimate(
            flops=6 * n_pad * c,
            transcendentals=2 * n_pad * c,
            bytes_accessed=n_pad * c * itemsize + 2 * n_pad * 4,
        ),
    )(y_pred, labels)[0, :n]

    if reduction == "mean":
        return jnp.mean(per_sample)
    if reduction == "sum":
        return jnp.sum(per_sample)
    return per_sample


def _reference(y_pred, y, beta=0.95, reduction="mean"):
    y_pred = y_pred.astype(jnp.float32)
    logp = jax.nn.log_softmax(y_pred, axis=1)
    p = jax.nn.softmax(y_pred, axis=1)
    ce = -jnp.take_along_axis(logp, y[:, None].astype(jnp.int32), axis=1)[:, 0]
    boot = -jnp.sum(p * logp, axis=1)
    per = beta * ce + (1.0 - beta) * boot
    if reduction == "mean":
        return jnp.mean(per)
    if reduction == "sum":
        return jnp.sum(per)
    return per


if __name__ == "__main__":
    key = jax.random.PRNGKey(0)
    k1, k2, k3, k4 = jax.random.split(key, 4)

    # Small shape matching the module's forward: (N, C) logits, (N,) labels.
    N, C = 8, 32
    y_pred = jax.random.normal(k1, (N, C), dtype=jnp.float32)
    y = jax.random.randint(k2, (N,), 0, C, dtype=jnp.int32)

    for red in ("mean", "sum", "none"):
        out = jax.block_until_ready(
            soft_bootstrapping_loss(y_pred, y, beta=0.95, reduction=red))
        ref = _reference(y_pred, y, beta=0.95, reduction=red)
        assert jnp.allclose(out, ref, rtol=1e-5, atol=1e-5), (red, out, ref)

    # bf16 input path (no wrapper upcast; cast happens inside the kernel).
    out_bf16 = jax.block_until_ready(
        soft_bootstrapping_loss(y_pred.astype(jnp.bfloat16), y, beta=0.95,
                                reduction="mean"))
    ref_bf16 = _reference(y_pred.astype(jnp.bfloat16), y, beta=0.95,
                          reduction="mean")
    assert jnp.allclose(out_bf16, ref_bf16, rtol=2e-2, atol=2e-2), (
        out_bf16, ref_bf16)

    # Multi-tile + padding path (N not a multiple of the row tile).
    N2, C2 = 2560, 32
    y_pred2 = jax.random.normal(k3, (N2, C2), dtype=jnp.float32)
    y2 = jax.random.randint(k4, (N2,), 0, C2, dtype=jnp.int32)
    out2 = jax.block_until_ready(
        soft_bootstrapping_loss(y_pred2, y2, beta=0.95, reduction="mean"))
    ref2 = _reference(y_pred2, y2, beta=0.95, reduction="mean")
    assert jnp.allclose(out2, ref2, rtol=1e-5, atol=1e-5), (out2, ref2)

    print("KERNEL_OK")
</pallas_src>

<mosaic_0001>
module attributes {stable_mosaic.version = 11 : i64} {
  func.func @_soft_bootstrap_kernel(%arg0: i32, %arg1: memref<128x32xf32, #tpu.memory_space<vmem>>, %arg2: memref<128x1xi32, #tpu.memory_space<vmem>>, %arg3: memref<1x128xf32, #tpu.memory_space<vmem>>) attributes {dimension_semantics = [#tpu.dimension_semantics<parallel>], iteration_bounds = array<i64: 1>, scalar_prefetch = 0 : i64, scratch_operands = 0 : i64, tpu.core_type = #tpu.core_type<tc>, window_params = [{transform_indices = @transform_0, window_bounds = array<i64: 128, 32>}, {transform_indices = @transform_1, window_bounds = array<i64: 128, 1>}, {transform_indices = @transform_2, window_bounds = array<i64: 1, 128>}]} {
    %c0 = arith.constant 0 : index
    %c0_0 = arith.constant 0 : index
    %0 = vector.load %arg1[%c0, %c0_0] : memref<128x32xf32, #tpu.memory_space<vmem>>, vector<128x32xf32>
    %c0_1 = arith.constant 0 : index
    %c0_2 = arith.constant 0 : index
    %1 = vector.load %arg2[%c0_1, %c0_2] : memref<128x1xi32, #tpu.memory_space<vmem>>, vector<128x1xi32>
    %cst = arith.constant dense<0xFF800000> : vector<128xf32>
    %2 = vector.multi_reduction <maximumf>, %0, %cst [1] : vector<128x32xf32> to vector<128xf32>
    %3 = vector.shape_cast %2 : vector<128xf32> to vector<128x1xf32>
    %4 = vector.broadcast %3 : vector<128x1xf32> to vector<128x32xf32>
    %5 = arith.subf %0, %4 : vector<128x32xf32>
    %6 = math.exp %5 : vector<128x32xf32>
    %cst_3 = arith.constant dense<0.000000e+00> : vector<128xf32>
    %7 = vector.multi_reduction <add>, %6, %cst_3 [1] : vector<128x32xf32> to vector<128xf32>
    %8 = vector.shape_cast %7 : vector<128xf32> to vector<128x1xf32>
    %9 = math.log %8 : vector<128x1xf32>
    %10 = vector.broadcast %9 : vector<128x1xf32> to vector<128x32xf32>
    %11 = arith.subf %5, %10 : vector<128x32xf32>
    %12 = tpu.iota {dimensions = array<i32: 1>} : vector<128x32xi32>
    %13 = vector.broadcast %1 : vector<128x1xi32> to vector<128x32xi32>
    %14 = arith.cmpi eq, %12, %13 : vector<128x32xi32>
    %cst_4 = arith.constant 0.000000e+00 : f32
    %15 = vector.broadcast %cst_4 : f32 to vector<128x32xf32>
    %16 = arith.select %14, %11, %15 : vector<128x32xi1>, vector<128x32xf32>
    %cst_5 = arith.constant dense<0.000000e+00> : vector<128xf32>
    %17 = vector.multi_reduction <add>, %16, %cst_5 [1] : vector<128x32xf32> to vector<128xf32>
    %cst_6 = arith.constant 0.000000e+00 : f32
    %18 = vector.broadcast %cst_6 : f32 to vector<128xf32>
    %19 = arith.subf %18, %17 : vector<128xf32>
    %20 = math.exp %11 : vector<128x32xf32>
    %21 = arith.mulf %20, %11 : vector<128x32xf32>
    %cst_7 = arith.constant dense<0.000000e+00> : vector<128xf32>
    %22 = vector.multi_reduction <add>, %21, %cst_7 [1] : vector<128x32xf32> to vector<128xf32>
    %cst_8 = arith.constant 0.000000e+00 : f32
    %23 = vector.broadcast %cst_8 : f32 to vector<128xf32>
    %24 = arith.subf %23, %22 : vector<128xf32>
    %cst_9 = arith.constant 0.949999988 : f32
    %25 = vector.broadcast %cst_9 : f32 to vector<128xf32>
    %26 = arith.mulf %25, %19 : vector<128xf32>
    %cst_10 = arith.constant 5.000000e-02 : f32
    %27 = vector.broadcast %cst_10 : f32 to vector<128xf32>
    %28 = arith.mulf %27, %24 : vector<128xf32>
    %29 = arith.addf %26, %28 : vector<128xf32>
    %30 = vector.shape_cast %29 : vector<128xf32> to vector<1x128xf32>
    %c0_11 = arith.constant 0 : index
    %c0_12 = arith.constant 0 : index
    %31 = vector.load %arg3[%c0_11, %c0_12] : memref<1x128xf32, #tpu.memory_space<vmem>>, vector<1x128xf32>
    tpu.vector_store %arg3[%c0_11, %c0_12], %30 {strides = array<i32>} : memref<1x128xf32, #tpu.memory_space<vmem>>, vector<1x128xf32>,
    return
  }
  func.func @transform_0(%arg0: i32) -> (i32, i32) {
    %c0_i32 = arith.constant 0 : i32
    %c0_i32_0 = arith.constant 0 : i32
    return %arg0, %c0_i32 : i32, i32
  }
  func.func @transform_1(%arg0: i32) -> (i32, i32) {
    %c0_i32 = arith.constant 0 : i32
    %c0_i32_0 = arith.constant 0 : i32
    return %arg0, %c0_i32 : i32, i32
  }
  func.func @transform_2(%arg0: i32) -> (i32, i32) {
    %c0_i32 = arith.constant 0 : i32
    %c0_i32_0 = arith.constant 0 : i32
    return %c0_i32, %arg0 : i32, i32
  }
}

</mosaic_0001>

<bundles_post_ra>
// kernel: tpu_custom_call.1
= control target key start
LH: loop header
LB: loop body
LE: loop exit
PB: predicated region body
PF: predicated region fallthrough
CT: control target
= control target key end

     0   :  { %vm44_vm0 = vcmask 261120   ;;  %v808_v6 = vmov 0   ;;  %s1344_s0 = inlined_call_operand.vmem [shape: f32[128,32], index: 0, kind: input, shape index: {}]   ;;  %s1345_s1 = inlined_call_operand.vmem [shape: s32[128,1], index: 1, kind: input, shape index: {}]   ;;  %s1346_s2 = inlined_call_operand.hbm [shape: f32[1,128], index: 2, kind: output, shape index: {}]  }
   0x1   :  { %v828_v0 = vld [vmem:[%s1344_s0] sm:$0xff]  ;;  %v833_v1 = vld [vmem:[%s1344_s0 + $0x10] sm:$0xff]  ;;  %v838_v2 = vld [vmem:[%s1344_s0 + $0x8] sm:$0xff]  ;;  %687 = vset.pattern.permute.xlu1 %v808_v6  ;;  %686 = vset.pattern.permute.xlu0 %v808_v6 }
   0x2   :  { %v45_v3 = vsel %vm44_vm0, %v828_v0, -inf  ;;  %v51_v4 = vsel %vm44_vm0, %v833_v1, -inf  ;;  %v847_v5 = vld [vmem:[%s1344_s0 + $0x18] sm:$0xff]  ;;  %v48_v7 = vsel %vm44_vm0, %v838_v2, -inf  ;;  %v856_v9 = vld [vmem:[%s1344_s0 + $0x20] sm:$0xff]  ;;  %v861_v10 = vld [vmem:[%s1344_s0 + $0x28] sm:$0xff] }
   0x3   :  { %46 = vmax.xlane.f32.xlu0 %v45_v3  ;;  %52 = vmax.xlane.f32.xlu1 %v51_v4  ;;  %v54_v8 = vsel %vm44_vm0, %v847_v5, -inf  ;;  %v57_v11 = vsel %vm44_vm0, %v856_v9, -inf  ;;  %v60_v12 = vsel %vm44_vm0, %v861_v10, -inf  ;;  %v870_v13 = vld [vmem:[%s1344_s0 + $0x30] sm:$0xff]  ;;  %v875_v14 = vld [vmem:[%s1344_s0 + $0x38] sm:$0xff] }
   0x7   :  { %49 = vmax.xlane.f32.xlu0 %v48_v7  ;;  %55 = vmax.xlane.f32.xlu1 %v54_v8 }
   0xb   :  { %58 = vmax.xlane.f32.xlu0 %v57_v11  ;;  %61 = vmax.xlane.f32.xlu1 %v60_v12 }
   0xc   :  { %7 = vsyncpa [#allocation3], 0  ;;  %v63_v15 = vsel %vm44_vm0, %v870_v13, -inf  ;;  %v66_v16 = vsel %vm44_vm0, %v875_v14, -inf  ;;  %v884_v17 = vld [vmem:[%s1344_s0 + $0x40] sm:$0xff]  ;;  %v889_v18 = vld [vmem:[%s1344_s0 + $0x48] sm:$0xff] }
   0xd   :  { %v69_v19 = vsel %vm44_vm0, %v884_v17, -inf  ;;  %v72_v20 = vsel %vm44_vm0, %v889_v18, -inf  ;;  %v898_v21 = vld [vmem:[%s1344_s0 + $0x50] sm:$0xff]  ;;  %v903_v22 = vld [vmem:[%s1344_s0 + $0x58] sm:$0xff]  ;;  %v912_v25 = vld [vmem:[%s1344_s0 + $0x60] sm:$0xff] }
   0xe   :  { %v75_v23 = vsel %vm44_vm0, %v898_v21, -inf  ;;  %v78_v24 = vsel %vm44_vm0, %v903_v22, -inf  ;;  %v917_v26 = vld [vmem:[%s1344_s0 + $0x68] sm:$0xff]  ;;  %v81_v27 = vsel %vm44_vm0, %v912_v25, -inf  ;;  %v926_v29 = vld [vmem:[%s1344_s0 + $0x70] sm:$0xff]  ;;  %v931_v30 = vld [vmem:[%s1344_s0 + $0x78] sm:$0xff] }
   0xf   :  { %64 = vmax.xlane.f32.xlu0 %v63_v15  ;;  %67 = vmax.xlane.f32.xlu1 %v66_v16  ;;  %v84_v28 = vsel %vm44_vm0, %v917_v26, -inf  ;;  %v87_v31 = vsel %vm44_vm0, %v926_v29, -inf  ;;  %v90_v32 = vsel %vm44_vm0, %v931_v30, -inf  ;;  %v29_v33 = vld [vmem:[%s1345_s1 + $0x8] sm:$0xff]  ;;  %v30_v34 = vld [vmem:[%s1345_s1 + $0x10] sm:$0xff]  ;;  %v28_v35 = vld [vmem:[%s1345_s1] sm:$0xff] }
  0x10   :  { %v31_v36 = vld [vmem:[%s1345_s1 + $0x18] sm:$0xff]  ;;  %v37_v37 = vld [vmem:[%s1345_s1 + $0x48] sm:$0xff]  ;;  %v32_v38 = vld [vmem:[%s1345_s1 + $0x20] sm:$0xff] }
  0x11   :  { %v39_v39 = vld [vmem:[%s1345_s1 + $0x58] sm:$0xff]  ;;  %v33_v40 = vld [vmem:[%s1345_s1 + $0x28] sm:$0xff]  ;;  %v34_v42 = vld [vmem:[%s1345_s1 + $0x30] sm:$0xff] }
  0x12   :  { %v41_v41 = vld [vmem:[%s1345_s1 + $0x68] sm:$0xff]  ;;  %v35_v43 = vld [vmem:[%s1345_s1 + $0x38] sm:$0xff]  ;;  %v36_v44 = vld [vmem:[%s1345_s1 + $0x40] sm:$0xff] }
  0x13   :  { %70 = vmax.xlane.f32.xlu0 %v69_v19  ;;  %73 = vmax.xlane.f32.xlu1 %v72_v20  ;;  %v38_v45 = vld [vmem:[%s1345_s1 + $0x50] sm:$0xff]  ;;  %v40_v46 = vld [vmem:[%s1345_s1 + $0x60] sm:$0xff] }
  0x17   :  { %76 = vmax.xlane.f32.xlu0 %v75_v23  ;;  %79 = vmax.xlane.f32.xlu1 %v78_v24 }
  0x1b   :  { %82 = vmax.xlane.f32.xlu0 %v81_v27  ;;  %85 = vmax.xlane.f32.xlu1 %v84_v28 }
  0x1f   :  { %88 = vmax.xlane.f32.xlu0 %v87_v31  ;;  %91 = vmax.xlane.f32.xlu1 %v90_v32 }
  0x30   :  { %243 = vperm.xlu1 %687, %v29_v33  }
  0x34   :  { %246 = vperm.xlu1 %687, %v30_v34  }
  0x35   :  { %240 = vperm.xlu0 %686, %v28_v35  }
  0x38   :  { %249 = vperm.xlu1 %687, %v31_v36  }
  0x39   :  { %267 = vperm.xlu0 %686, %v37_v37  }
  0x3c   :  { %252 = vperm.xlu1 %687, %v32_v38  }
  0x3d   :  { %273 = vperm.xlu0 %686, %v39_v39  }
  0x40   :  { %255 = vperm.xlu1 %687, %v33_v40  }
  0x41   :  { %279 = vperm.xlu0 %686, %v41_v41  }
  0x44   :  { %258 = vperm.xlu1 %687, %v34_v42  }
  0x48   :  { %261 = vperm.xlu1 %687, %v35_v43  }
  0x4c   :  { %264 = vperm.xlu1 %687, %v36_v44  }
  0x50   :  { %270 = vperm.xlu1 %687, %v38_v45  }
  0x54   :  { %276 = vperm.xlu1 %687, %v40_v46  }
  0x90   :  { %v47_v47 = vpop.xlane.xlu0 %46  ;;  %v53_v48 = vpop.xlane.xlu1 %52 }
  0x91   :  { %v980_v49 = vsub.f32 %v828_v0, %v47_v47  ;;  %v983_v50 = vsub.f32 %v833_v1, %v53_v48 }
  0x93   :  { %v109_v51 = vmul.f32 1.442695, %v980_v49  ;;  %v113_v52 = vmul.f32 1.442695, %v983_v50 }
  0x94   :  { %v50_v53 = vpop.xlane.xlu0 %49  ;;  %v56_v54 = vpop.xlane.xlu1 %55 }
  0x95   :  { %688 = vpow2.f32 %v109_v51  ;;  %v988_v55 = vsub.f32 %v838_v2, %v50_v53  ;;  %v991_v56 = vsub.f32 %v847_v5, %v56_v54 }
  0x96   :  { %690 = vpow2.f32 %v113_v52 }
  0x97   :  { %v111_v57 = vmul.f32 1.442695, %v988_v55  ;;  %v115_v58 = vmul.f32 1.442695, %v991_v56 }
  0x98   :  { %v59_v59 = vpop.xlane.xlu0 %58  ;;  %v62_v60 = vpop.xlane.xlu1 %61 }
  0x99   :  { %692 = vpow2.f32 %v111_v57  ;;  %v996_v61 = vsub.f32 %v856_v9, %v59_v59  ;;  %v999_v62 = vsub.f32 %v861_v10, %v62_v60 }
  0x9a   :  { %694 = vpow2.f32 %v115_v58 }
  0x9b   :  { %v117_v63 = vmul.f32 1.442695, %v996_v61  ;;  %v119_v0 = vmul.f32 1.442695, %v999_v62 }
  0x9c   :  { %v65_v1 = vpop.xlane.xlu0 %64  ;;  %v68_v2 = vpop.xlane.xlu1 %67 }
  0x9d   :  { %696 = vpow2.f32 %v117_v63  ;;  %v1004_v3 = vsub.f32 %v870_v13, %v65_v1  ;;  %v1007_v4 = vsub.f32 %v875_v14, %v68_v2 }
  0x9e   :  { %698 = vpow2.f32 %v119_v0 }
  0x9f   :  { %v689_v5 = vpop.eup %688  ;;  %v121_v6 = vmul.f32 1.442695, %v1004_v3  ;;  %v123_v7 = vmul.f32 1.442695, %v1007_v4 }
  0xa0   :  { %v691_v8 = vpop.eup %690  ;;  %v71_v9 = vpop.xlane.xlu0 %70  ;;  %v141_v10 = vsel %vm44_vm0, %v689_v5, 0.0 }
  0xa1   :  { %v74_v11 = vpop.xlane.xlu1 %73  ;;  %700 = vpow2.f32 %v121_v6  ;;  %v1013_v12 = vsub.f32 %v884_v17, %v71_v9  ;;  %142 = vadd.xlane.f32.xlu0 %v141_v10  ;;  %v147_v14 = vsel %vm44_vm0, %v691_v8, 0.0  ;;  %v43_v8 = vld [vmem:[%s1345_s1 + $0x78] sm:$0xff] }
  0xa2   :  { %v1016_v13 = vsub.f32 %v889_v18, %v74_v11  ;;  %702 = vpow2.f32 %v123_v7  ;;  %v42_v7 = vld [vmem:[%s1345_s1 + $0x70] sm:$0xff]  ;;  %s809_s1 = smov [#allocation2]  }
  0xa3   :  { %v693_v15 = vpop.eup %692  ;;  %v125_v16 = vmul.f32 1.442695, %v1013_v12  ;;  %s676_s16 = sshll.u32 %s809_s1, 4  ;;  %s677_s16 = int_to_ptr.vmem [resolvable:$true] %s676_s16 }
  0xa4   :  { %v127_v19 = vmul.f32 1.442695, %v1016_v13  ;;  %v695_v20 = vpop.eup %694  ;;  %v77_v23 = vpop.xlane.xlu0 %76  ;;  %v144_v24 = vsel %vm44_vm0, %v693_v15, 0.0  ;;  %s784_s0 = scalar_lea.vmem %s677_s16, 16  ;;  %s788_s17 = scalar_lea.vmem %s677_s16, 32 }
  0xa5   :  { %v80_v27 = vpop.xlane.xlu1 %79  ;;  %704 = vpow2.f32 %v125_v16  ;;  %v1023_v17 = vsub.f32 %v898_v21, %v77_v23  ;;  %148 = vadd.xlane.f32.xlu0 %v147_v14  ;;  %145 = vadd.xlane.f32.xlu1 %v144_v24  ;;  %v150_v28 = vsel %vm44_vm0, %v695_v20, 0.0  ;;  %p785_p0 = scmp.ne.s32.totalorder %s677_s16, %s784_s0  ;;  %p789_p1 = scmp.lt.s32.totalorder %s677_s16, %s677_s16 }
  0xa6   :  { %v1026_v18 = vsub.f32 %v903_v22, %v80_v27  ;;  %706 = vpow2.f32 %v127_v19  ;;  %p790_p2 = scmp.lt.s32.totalorder %s788_s17, %s784_s0 }
  0xa7   :  { %v697_v31 = vpop.eup %696  ;;  %v129_v32 = vmul.f32 1.442695, %v1023_v17 }
  0xa8   :  { %v131_v33 = vmul.f32 1.442695, %v1026_v18  ;;  %v699_v34 = vpop.eup %698  ;;  %v83_v35 = vpop.xlane.xlu0 %82  ;;  %v153_v36 = vsel %vm44_vm0, %v697_v31, 0.0  ;;  %p791_p3 = por %p790_p2, %p789_p1 }
  0xa9   :  { %v86_v37 = vpop.xlane.xlu1 %85  ;;  %708 = vpow2.f32 %v129_v32  ;;  %v1033_v21 = vsub.f32 %v912_v25, %v83_v35  ;;  %151 = vadd.xlane.f32.xlu1 %v150_v28  ;;  %154 = vadd.xlane.f32.xlu0 %v153_v36  ;;  %v156_v38 = vsel %vm44_vm0, %v699_v34, 0.0 }
  0xaa   :  { %v1036_v22 = vsub.f32 %v917_v26, %v86_v37  ;;  %710 = vpow2.f32 %v131_v33  ;;  %p792_p4 = pnand %p791_p3, %p785_p0 }
  0xab   :  { %v701_v39 = vpop.eup %700  ;;  %v133_v40 = vmul.f32 1.442695, %v1033_v21 }
  0xac   :  { %v135_v41 = vmul.f32 1.442695, %v1036_v22  ;;  %v703_v42 = vpop.eup %702  ;;  %v89_v43 = vpop.xlane.xlu0 %88  ;;  %v159_v44 = vsel %vm44_vm0, %v701_v39, 0.0 }
  0xad   :  { %v92_v45 = vpop.xlane.xlu1 %91  ;;  %712 = vpow2.f32 %v133_v40  ;;  %v1043_v25 = vsub.f32 %v926_v29, %v89_v43  ;;  %157 = vadd.xlane.f32.xlu1 %v156_v38  ;;  %160 = vadd.xlane.f32.xlu0 %v159_v44  ;;  %v162_v46 = vsel %vm44_vm0, %v703_v42, 0.0  ;;  %v237_v38 = vlaneseq }
  0xae   :  { %v1046_v26 = vsub.f32 %v931_v30, %v92_v45  ;;  %714 = vpow2.f32 %v135_v41 }
  0xaf   :  { %v705_v47 = vpop.eup %704  ;;  %v137_v48 = vmul.f32 1.442695, %v1043_v25  ;;  %v1088_v43 = vand.u32 127, %v237_v38 }
  0xb0   :  { %v139_v51 = vmul.f32 1.442695, %v1046_v26  ;;  %v707_v52 = vpop.eup %706  ;;  %v165_v53 = vsel %vm44_vm0, %v705_v47, 0.0 }
  0xb1   :  { %716 = vpow2.f32 %v137_v48  ;;  %163 = vadd.xlane.f32.xlu1 %v162_v46  ;;  %166 = vadd.xlane.f32.xlu0 %v165_v53  ;;  %v168_v29 = vsel %vm44_vm0, %v707_v52, 0.0  ;;  %v244_v9 = vpop.permute.xlu1 %243 }
  0xb2   :  { %718 = vpow2.f32 %v139_v51  ;;  %vm288_vm2 = vcmp.eq.s32.totalorder %v1088_v43, %v244_v9 }
  0xb3   :  { %v709_v54 = vpop.eup %708 }
  0xb4   :  { %v711_v30 = vpop.eup %710  ;;  %v171_v57 = vsel %vm44_vm0, %v709_v54, 0.0  ;;  %v241_v19 = vpop.permute.xlu0 %240 }
  0xb5   :  { %169 = vadd.xlane.f32.xlu1 %v168_v29  ;;  %172 = vadd.xlane.f32.xlu0 %v171_v57  ;;  %v174_v58 = vsel %vm44_vm0, %v711_v30, 0.0  ;;  %v247_v10 = vpop.permute.xlu1 %246  ;;  %vm287_vm1 = vcmp.eq.s32.totalorder %v1088_v43, %v241_v19 }
  0xb6   :  { %vm289_vm3 = vcmp.eq.s32.totalorder %v1088_v43, %v247_v10 }
  0xb7   :  { %v713_v59 = vpop.eup %712 }
  0xb8   :  { %v715_v60 = vpop.eup %714  ;;  %v177_v63 = vsel %vm44_vm0, %v713_v59, 0.0  ;;  %v1075_v23 = vpop.permute.xlu0 %267 }
  0xb9   :  { %175 = vadd.xlane.f32.xlu1 %v174_v58  ;;  %178 = vadd.xlane.f32.xlu0 %v177_v63  ;;  %v180_v0 = vsel %vm44_vm0, %v715_v60, 0.0  ;;  %v1065_v11 = vpop.permute.xlu1 %249  ;;  %vm296_vm10 = vcmp.eq.s32.totalorder %v1088_v43, %v1075_v23 }
  0xba   :  { %vm290_vm4 = vcmp.eq.s32.totalorder %v1088_v43, %v1065_v11 }
  0xbb   :  { %v717_v1 = vpop.eup %716 }
  0xbc   :  { %v719_v2 = vpop.eup %718  ;;  %v183_v5 = vsel %vm44_vm0, %v717_v1, 0.0  ;;  %v1079_v27 = vpop.permute.xlu0 %273 }
  0xbd   :  { %181 = vadd.xlane.f32.xlu1 %v180_v0  ;;  %184 = vadd.xlane.f32.xlu0 %v183_v5  ;;  %v186_v6 = vsel %vm44_vm0, %v719_v2, 0.0  ;;  %v1067_v14 = vpop.permute.xlu1 %252  ;;  %vm298_vm12 = vcmp.eq.s32.totalorder %v1088_v43, %v1079_v27 }
  0xbe   :  { %vm291_vm5 = vcmp.eq.s32.totalorder %v1088_v43, %v1067_v14 }
  0xc0   :  { %v1083_v31 = vpop.permute.xlu0 %279 }
  0xc1   :  { %187 = vadd.xlane.f32.xlu1 %v186_v6  ;;  %v1069_v15 = vpop.permute.xlu1 %255  ;;  %vm300_vm14 = vcmp.eq.s32.totalorder %v1088_v43, %v1083_v31 }
  0xc2   :  { %vm292_vm6 = vcmp.eq.s32.totalorder %v1088_v43, %v1069_v15 }
  0xc5   :  { %v1071_v16 = vpop.permute.xlu1 %258 }
  0xc6   :  { %vm293_vm7 = vcmp.eq.s32.totalorder %v1088_v43, %v1071_v16 }
  0xc9   :  { %v1073_v20 = vpop.permute.xlu1 %261 }
  0xca   :  { %vm294_vm8 = vcmp.eq.s32.totalorder %v1088_v43, %v1073_v20 }
  0xcd   :  { %v1077_v24 = vpop.permute.xlu1 %264 }
  0xce   :  { %vm295_vm9 = vcmp.eq.s32.totalorder %v1088_v43, %v1077_v24 }
  0xd1   :  { %v1081_v28 = vpop.permute.xlu1 %270 }
  0xd2   :  { %282 = vperm.xlu1 %687, %v42_v7   ;;  %vm297_vm11 = vcmp.eq.s32.totalorder %v1088_v43, %v1081_v28 }
  0xd3   :  { %285 = vperm.xlu0 %686, %v43_v8  }
  0xd5   :  { %v1085_v32 = vpop.permute.xlu1 %276 }
  0xd6   :  { %vm299_vm13 = vcmp.eq.s32.totalorder %v1088_v43, %v1085_v32 }
 0x12e   :  { %v143_v33 = vpop.xlane.xlu0 %142 }
 0x12f   :  { %720 = vlog2.f32 %v143_v33 }
 0x132   :  { %v146_v34 = vpop.xlane.xlu1 %145  ;;  %v149_v35 = vpop.xlane.xlu0 %148 }
 0x133   :  { %722 = vlog2.f32 %v146_v34 }
 0x134   :  { %724 = vlog2.f32 %v149_v35 }
 0x136   :  { %v152_v36 = vpop.xlane.xlu1 %151  ;;  %v155_v37 = vpop.xlane.xlu0 %154 }
 0x137   :  { %726 = vlog2.f32 %v152_v36 }
 0x138   :  { %728 = vlog2.f32 %v155_v37 }
 0x139   :  { %v721_v39 = vpop.eup %720 }
 0x13a   :  { %v190_v40 = vmul.f32 0.6931472, %v721_v39  ;;  %v158_v41 = vpop.xlane.xlu1 %157  ;;  %v161_v42 = vpop.xlane.xlu0 %160 }
 0x13b   :  { %730 = vlog2.f32 %v158_v41 }
 0x13c   :  { %v1091_v44 = vsub.f32 %v980_v49, %v190_v40  ;;  %732 = vlog2.f32 %v161_v42 }
 0x13d   :  { %v723_v45 = vpop.eup %722 }
 0x13e   :  { %v725_v46 = vpop.eup %724  ;;  %v192_v47 = vmul.f32 0.6931472, %v723_v45  ;;  %v164_v48 = vpop.xlane.xlu1 %163  ;;  %v303_v51 = vsel %vm287_vm1, %v1091_v44, 0.0 }
 0x13f   :  { %v194_v52 = vmul.f32 0.6931472, %v725_v46  ;;  %734 = vlog2.f32 %v164_v48  ;;  %v319_v53 = vsel %vm44_vm0, %v303_v51, 0.0  ;;  %v167_v54 = vpop.xlane.xlu0 %166 }
 0x140   :  { %v222_v29 = vsub.f32 %v988_v55, %v192_v47  ;;  %320 = vadd.xlane.f32.xlu1 %v319_v53  ;;  %736 = vlog2.f32 %v167_v54 }
 0x141   :  { %v727_v30 = vpop.eup %726  ;;  %v223_v49 = vsub.f32 %v983_v50, %v194_v52 }
 0x142   :  { %v729_v57 = vpop.eup %728  ;;  %v385_v58 = vmul.f32 1.442695, %v222_v29  ;;  %v196_v59 = vmul.f32 0.6931472, %v727_v30  ;;  %v304_v60 = vsel %vm288_vm2, %v222_v29, 0.0  ;;  %v170_v2 = vpop.xlane.xlu1 %169  ;;  %vm575_vm2 = vcmask 195712  }
 0x143   :  { %v387_v63 = vmul.f32 1.442695, %v223_v49  ;;  %v198_v0 = vmul.f32 0.6931472, %v729_v57  ;;  %v322_v1 = vsel %vm44_vm0, %v304_v60, 0.0  ;;  %v305_v5 = vsel %vm289_vm3, %v223_v49, 0.0  ;;  %v173_v35 = vpop.xlane.xlu0 %172 }
 0x144   :  { %738 = vpow2.f32 %v385_v58  ;;  %v224_v55 = vsub.f32 %v991_v56, %v196_v59  ;;  %323 = vadd.xlane.f32.xlu0 %v322_v1  ;;  %v325_v10 = vsel %vm44_vm0, %v305_v5, 0.0  ;;  %vm582_vm3 = vcmask 261312  }
 0x145   :  { %v731_v6 = vpop.eup %730  ;;  %740 = vpow2.f32 %v387_v63  ;;  %v1103_v50 = vsub.f32 %v996_v61, %v198_v0 }
 0x146   :  { %v733_v7 = vpop.eup %732  ;;  %v389_v8 = vmul.f32 1.442695, %v224_v55  ;;  %v200_v9 = vmul.f32 0.6931472, %v731_v6  ;;  %742 = vlog2.f32 %v170_v2  ;;  %v306_v19 = vsel %vm290_vm4, %v224_v55, 0.0  ;;  %v176_v11 = vpop.xlane.xlu1 %175 }
 0x147   :  { %v391_v56 = vmul.f32 1.442695, %v1103_v50  ;;  %v202_v34 = vmul.f32 0.6931472, %v733_v7  ;;  %v328_v36 = vsel %vm44_vm0, %v306_v19, 0.0  ;;  %v307_v37 = vsel %vm291_vm5, %v1103_v50, 0.0  ;;  %v179_v52 = vpop.xlane.xlu0 %178 }
 0x148   :  { %744 = vpow2.f32 %v389_v8  ;;  %v1110_v33 = vsub.f32 %v999_v62, %v200_v9  ;;  %326 = vadd.xlane.f32.xlu0 %v325_v10  ;;  %v331_v45 = vsel %vm44_vm0, %v307_v37, 0.0  ;;  %v383_v10 = vmul.f32 1.442695, %v1091_v44 }
 0x149   :  { %v735_v61 = vpop.eup %734  ;;  %746 = vlog2.f32 %v173_v35  ;;  %v1118_v40 = vsub.f32 %v1004_v3, %v202_v34  ;;  %vm589_vm4 = vcmask 326912   ;;  %vm596_vm5 = vcmask 392512  }
 0x14a   :  { %748 = vpow2.f32 %v391_v56  ;;  %v393_v39 = vmul.f32 1.442695, %v1110_v33  ;;  %v204_v62 = vmul.f32 0.6931472, %v735_v61  ;;  %v737_v41 = vpop.eup %736  ;;  %v308_v47 = vsel %vm292_vm6, %v1110_v33, 0.0  ;;  %v182_v60 = vpop.xlane.xlu1 %181 }
 0x14b   :  { %750 = vlog2.f32 %v176_v11  ;;  %v395_v48 = vmul.f32 1.442695, %v1118_v40  ;;  %v206_v51 = vmul.f32 0.6931472, %v737_v41  ;;  %v309_v57 = vsel %vm293_vm7, %v1118_v40, 0.0  ;;  %v185_v8 = vpop.xlane.xlu0 %184 }
 0x14c   :  { %329 = vadd.xlane.f32.xlu0 %v328_v36  ;;  %752 = vpow2.f32 %v393_v39  ;;  %v1126_v3 = vsub.f32 %v1007_v4, %v204_v62  ;;  %v337_v1 = vsel %vm44_vm0, %v309_v57, 0.0  ;;  %vm603_vm6 = vcmask 458112  }
 0x14d   :  { %754 = vlog2.f32 %v179_v52  ;;  %v1135_v58 = vsub.f32 %v1013_v12, %v206_v51  ;;  %vm610_vm7 = vcmask 523712  }
 0x14e   :  { %v739_v42 = vpop.eup %738  ;;  %756 = vpow2.f32 %v395_v48  ;;  %v397_v4 = vmul.f32 1.442695, %v1126_v3  ;;  %v310_v2 = vsel %vm294_vm8, %v1126_v3, 0.0  ;;  %v188_v35 = vpop.xlane.xlu1 %187  ;;  %vm617_vm8 = vcmask 589312  }
 0x14f   :  { %v741_v14 = vpop.eup %740  ;;  %v416_v46 = vmul.f32 %v739_v42, %v222_v29  ;;  %v334_v29 = vsel %vm44_vm0, %v308_v47, 0.0  ;;  %758 = vlog2.f32 %v182_v60  ;;  %v399_v12 = vmul.f32 1.442695, %v1135_v58 }
 0x150   :  { %332 = vadd.xlane.f32.xlu0 %v331_v45  ;;  %v743_v53 = vpop.eup %742  ;;  %v417_v15 = vmul.f32 %v741_v14, %v223_v49  ;;  %760 = vpow2.f32 %v397_v4  ;;  %v340_v56 = vsel %vm44_vm0, %v310_v2, 0.0 }
 0x151   :  { %v434_v54 = vsel %vm44_vm0, %v416_v46, 0.0  ;;  %v208_v59 = vmul.f32 0.6931472, %v743_v53  ;;  %762 = vlog2.f32 %v185_v8 }
 0x152   :  { %v745_v30 = vpop.eup %744  ;;  %435 = vadd.xlane.f32.xlu1 %v434_v54  ;;  %v437_v63 = vsel %vm44_vm0, %v417_v15, 0.0  ;;  %764 = vpow2.f32 %v399_v12  ;;  %v283_v8 = vpop.permute.xlu1 %282 }
 0x153   :  { %v747_v49 = vpop.eup %746  ;;  %v418_v0 = vmul.f32 %v745_v30, %v224_v55  ;;  %v1144_v6 = vsub.f32 %v1016_v13, %v208_v59  ;;  %766 = vpow2.f32 %v383_v10  ;;  %vm301_vm15 = vcmp.eq.s32.totalorder %v1088_v43, %v283_v8 }
 0x154   :  { %335 = vadd.xlane.f32.xlu0 %v334_v29  ;;  %v749_v16 = vpop.eup %748  ;;  %v210_v7 = vmul.f32 0.6931472, %v747_v49  ;;  %768 = vlog2.f32 %v188_v35 }
 0x155   :  { %v751_v5 = vpop.eup %750  ;;  %v440_v55 = vsel %vm44_vm0, %v418_v0, 0.0  ;;  %v419_v20 = vmul.f32 %v749_v16, %v1103_v50  ;;  %v401_v13 = vmul.f32 1.442695, %v1144_v6  ;;  %v311_v50 = vsel %vm295_vm9, %v1135_v58, 0.0 }
 0x156   :  { %438 = vadd.xlane.f32.xlu1 %v437_v63  ;;  %v753_v9 = vpop.eup %752  ;;  %v212_v19 = vmul.f32 0.6931472, %v751_v5  ;;  %v1154_v34 = vsub.f32 %v1023_v17, %v210_v7  ;;  %v343_v17 = vsel %vm44_vm0, %v311_v50, 0.0  ;;  %v312_v41 = vsel %vm296_vm10, %v1144_v6, 0.0 }
 0x157   :  { %v755_v61 = vpop.eup %754  ;;  %v443_v11 = vsel %vm44_vm0, %v419_v20, 0.0  ;;  %v420_v36 = vmul.f32 %v753_v9, %v1110_v33  ;;  %770 = vpow2.f32 %v401_v13  ;;  %v346_v23 = vsel %vm44_vm0, %v312_v41, 0.0 }
 0x158   :  { %338 = vadd.xlane.f32.xlu0 %v337_v1  ;;  %v757_v24 = vpop.eup %756  ;;  %v1162_v37 = vsub.f32 %v1026_v18, %v212_v19  ;;  %v403_v39 = vmul.f32 1.442695, %v1154_v34  ;;  %v214_v62 = vmul.f32 0.6931472, %v755_v61  ;;  %v313_v48 = vsel %vm297_vm11, %v1154_v34, 0.0  ;;  %v286_v19 = vpop.permute.xlu0 %285 }
 0x159   :  { %v759_v33 = vpop.eup %758  ;;  %v446_v42 = vsel %vm44_vm0, %v420_v36, 0.0  ;;  %v421_v14 = vmul.f32 %v757_v24, %v1118_v40  ;;  %v349_v28 = vsel %vm44_vm0, %v313_v48, 0.0  ;;  %vm302_vm1 = vcmp.eq.s32.totalorder %v1088_v43, %v286_v19 }
 0x15a   :  { %441 = vadd.xlane.f32.xlu1 %v440_v55  ;;  %v761_v45 = vpop.eup %760  ;;  %v405_v18 = vmul.f32 1.442695, %v1162_v37  ;;  %772 = vpow2.f32 %v403_v39  ;;  %v1174_v46 = vsub.f32 %v1033_v21, %v214_v62  ;;  %v216_v47 = vmul.f32 0.6931472, %v759_v33 }
 0x15b   :  { %v763_v51 = vpop.eup %762  ;;  %v449_v40 = vsel %vm44_vm0, %v421_v14, 0.0  ;;  %v422_v52 = vmul.f32 %v761_v45, %v1126_v3  ;;  %v314_v29 = vsel %vm298_vm12, %v1162_v37, 0.0  ;;  %vm624_vm9 = vcmask 654912  }
 0x15c   :  { %341 = vadd.xlane.f32.xlu0 %v340_v56  ;;  %v765_v53 = vpop.eup %764  ;;  %774 = vpow2.f32 %v405_v18  ;;  %v407_v21 = vmul.f32 1.442695, %v1174_v46  ;;  %v234_v15 = vsub.f32 %v1036_v22, %v216_v47  ;;  %v218_v30 = vmul.f32 0.6931472, %v763_v51 }
 0x15d   :  { %v767_v54 = vpop.eup %766  ;;  %v452_v3 = vsel %vm44_vm0, %v422_v52, 0.0  ;;  %v423_v4 = vmul.f32 %v765_v53, %v1135_v58  ;;  %v352_v27 = vsel %vm44_vm0, %v314_v29, 0.0  ;;  %v1231_v29 = vadd.s32 4294967288, %v1088_v43 }
 0x15e   :  { %444 = vadd.xlane.f32.xlu1 %v443_v11  ;;  %v769_v57 = vpop.eup %768  ;;  %v415_v60 = vmul.f32 %v767_v54, %v1091_v44  ;;  %776 = vpow2.f32 %v407_v21  ;;  %v409_v49 = vmul.f32 1.442695, %v234_v15  ;;  %v235_v63 = vsub.f32 %v1043_v25, %v218_v30 }
 0x15f   :  { %v220_v22 = vmul.f32 0.6931472, %v769_v57  ;;  %v455_v0 = vsel %vm44_vm0, %v423_v4, 0.0  ;;  %v315_v25 = vsel %vm299_vm13, %v1174_v46, 0.0  ;;  %v316_v55 = vsel %vm300_vm14, %v234_v15, 0.0 }
 0x160   :  { %344 = vadd.xlane.f32.xlu0 %v343_v17  ;;  %v431_v58 = vsel %vm44_vm0, %v415_v60, 0.0  ;;  %778 = vpow2.f32 %v409_v49  ;;  %v411_v2 = vmul.f32 1.442695, %v235_v63  ;;  %v355_v32 = vsel %vm44_vm0, %v315_v25, 0.0 }
 0x161   :  { %v771_v59 = vpop.eup %770  ;;  %v236_v44 = vsub.f32 %v1046_v26, %v220_v22  ;;  %v358_v10 = vsel %vm44_vm0, %v316_v55, 0.0  ;;  %v317_v31 = vsel %vm301_vm15, %v235_v63, 0.0  ;;  %v1228_v30 = vshrl.u32 %v237_v38, 7 }
 0x162   :  { %447 = vadd.xlane.f32.xlu1 %v446_v42  ;;  %v424_v16 = vmul.f32 %v771_v59, %v1144_v6  ;;  %780 = vpow2.f32 %v411_v2  ;;  %v361_v35 = vsel %vm44_vm0, %v317_v31, 0.0  ;;  %v1234_v57 = vadd.s32 4294967280, %v1088_v43 }
 0x163   :  { %v413_v6 = vmul.f32 1.442695, %v236_v44  ;;  %v318_v50 = vsel %vm302_vm1, %v236_v44, 0.0  ;;  %v1240_v4 = vadd.s32 4294967264, %v1088_v43  ;;  %v1243_v59 = vadd.s32 4294967256, %v1088_v43 }
 0x164   :  { %347 = vadd.xlane.f32.xlu0 %v346_v23  ;;  %v773_v1 = vpop.eup %772  ;;  %v458_v12 = vsel %vm44_vm0, %v424_v16, 0.0  ;;  %v364_v24 = vsel %vm44_vm0, %v318_v50, 0.0  ;;  %v1248_v38 = vadd.s32 4294967248, %v1088_v43  ;;  %v1251_v60 = vadd.s32 4294967240, %v1088_v43 }
 0x165   :  { %v425_v7 = vmul.f32 %v773_v1, %v1154_v34  ;;  %782 = vpow2.f32 %v413_v6  ;;  %v566_v22 = vsub.s32 %v1231_v29, %v1228_v30  ;;  %v573_v16 = vsub.s32 %v1234_v57, %v1228_v30 }
 0x166   :  { %450 = vadd.xlane.f32.xlu1 %v449_v40  ;;  %v775_v5 = vpop.eup %774  ;;  %v594_v25 = vsub.s32 %v1243_v59, %v1228_v30  ;;  %v608_v6 = vsub.s32 %v1251_v60, %v1228_v30  ;;  %vm631_vm10 = vcmask 720512   ;;  %vm638_vm11 = vcmask 786112  }
 0x167   :  { %v461_v26 = vsel %vm44_vm0, %v425_v7, 0.0  ;;  %v426_v20 = vmul.f32 %v775_v5, %v1162_v37  ;;  %vm645_vm12 = vcmask 851712   ;;  %vm652_vm13 = vcmask 917312  }
 0x168   :  { %350 = vadd.xlane.f32.xlu0 %v349_v28  ;;  %v777_v9 = vpop.eup %776  ;;  %vm659_vm14 = vcmask 982912   ;;  %vm666_vm15 = vcmask 1048512  }
 0x169   :  { %v464_v56 = vsel %vm44_vm0, %v426_v20, 0.0  ;;  %v427_v13 = vmul.f32 %v777_v9, %v1174_v46  ;;  %v561_v9 = vsub.s32 %v1088_v43, %v1228_v30 }
 0x16a   :  { %453 = vadd.xlane.f32.xlu1 %v452_v3  ;;  %v779_v34 = vpop.eup %778  ;;  %v1237_v3 = vadd.s32 4294967272, %v1088_v43 }
 0x16b   :  { %v467_v61 = vsel %vm44_vm0, %v427_v13, 0.0  ;;  %v428_v11 = vmul.f32 %v779_v34, %v234_v15 }
 0x16c   :  { %353 = vadd.xlane.f32.xlu0 %v352_v27  ;;  %v781_v36 = vpop.eup %780  ;;  %v580_v1 = vsub.s32 %v1237_v3, %v1228_v30 }
 0x16d   :  { %v470_v37 = vsel %vm44_vm0, %v428_v11, 0.0  ;;  %v429_v17 = vmul.f32 %v781_v36, %v235_v63  ;;  %v1256_v63 = vadd.s32 4294967232, %v1088_v43 }
 0x16e   :  { %456 = vadd.xlane.f32.xlu1 %v455_v0 }
 0x16f   :  { %v783_v39 = vpop.eup %782  ;;  %v473_v62 = vsel %vm44_vm0, %v429_v17, 0.0 }
 0x170   :  { %432 = vadd.xlane.f32.xlu0 %v431_v58  ;;  %v430_v41 = vmul.f32 %v783_v39, %v236_v44  ;;  %v587_v44 = vsub.s32 %v1240_v4, %v1228_v30 }
 0x172   :  { %459 = vadd.xlane.f32.xlu1 %v458_v12  ;;  %v476_v33 = vsel %vm44_vm0, %v430_v41, 0.0  ;;  %vm568_vm0 = vcmask 130112  }
 0x174   :  { %356 = vadd.xlane.f32.xlu0 %v355_v32  ;;  %v601_v32 = vsub.s32 %v1248_v38, %v1228_v30 }
 0x176   :  { %462 = vadd.xlane.f32.xlu1 %v461_v26  ;;  %v615_v26 = vsub.s32 %v1256_v63, %v1228_v30 }
 0x178   :  { %359 = vadd.xlane.f32.xlu0 %v358_v10 }
 0x17a   :  { %465 = vadd.xlane.f32.xlu1 %v464_v56 }
 0x17c   :  { %362 = vadd.xlane.f32.xlu0 %v361_v35 }
 0x17e   :  { %468 = vadd.xlane.f32.xlu1 %v467_v61 }
 0x180   :  { %365 = vadd.xlane.f32.xlu0 %v364_v24 }
 0x182   :  { %471 = vadd.xlane.f32.xlu1 %v470_v37 }
 0x186   :  { %474 = vadd.xlane.f32.xlu1 %v473_v62 }
 0x18a   :  { %477 = vadd.xlane.f32.xlu1 %v476_v33 }
 0x1cd   :  { %v321_v18 = vpop.xlane.xlu1 %320 }
 0x1ce   :  { %v367_v58 = vsub.f32 0.0, %v321_v18 }
 0x1d0   :  { %v495_v56 = vmul.f32 0.95, %v367_v58 }
 0x1d1   :  { %v324_v42 = vpop.xlane.xlu0 %323 }
 0x1d2   :  { %v368_v12 = vsub.f32 0.0, %v324_v42 }
 0x1d4   :  { %v496_v50 = vmul.f32 0.95, %v368_v12  ;;  %v1289_v12 = vadd.s32 4294967216, %v1088_v43 }
 0x1d5   :  { %v327_v14 = vpop.xlane.xlu0 %326 }
 0x1d6   :  { %v369_v8 = vsub.f32 0.0, %v327_v14 }
 0x1d8   :  { %v497_v24 = vmul.f32 0.95, %v369_v8 }
 0x1d9   :  { %v330_v45 = vpop.xlane.xlu0 %329 }
 0x1da   :  { %v370_v10 = vsub.f32 0.0, %v330_v45 }
 0x1dc   :  { %v498_v62 = vmul.f32 0.95, %v370_v10 }
 0x1dd   :  { %v1215_v23 = vpop.xlane.xlu0 %332 }
 0x1de   :  { %v371_v13 = vsub.f32 0.0, %v1215_v23 }
 0x1df   :  { %v436_v46 = vpop.xlane.xlu1 %435 }
 0x1e0   :  { %v480_v0 = vsub.f32 0.0, %v436_v46  ;;  %v499_v14 = vmul.f32 0.95, %v371_v13 }
 0x1e1   :  { %v1217_v47 = vpop.xlane.xlu0 %335 }
 0x1e2   :  { %v512_v19 = vmul.f32 0.05, %v480_v0  ;;  %v372_v61 = vsub.f32 0.0, %v1217_v47 }
 0x1e3   :  { %v439_v48 = vpop.xlane.xlu1 %438 }
 0x1e4   :  { %v481_v2 = vsub.f32 0.0, %v439_v48  ;;  %v528_v41 = vadd.f32 %v512_v19, %v496_v50  ;;  %v500_v46 = vmul.f32 0.95, %v372_v61 }
 0x1e5   :  { %v1219_v51 = vpop.xlane.xlu0 %338 }
 0x1e6   :  { %v513_v34 = vmul.f32 0.05, %v481_v2  ;;  %v373_v18 = vsub.f32 0.0, %v1219_v51  ;;  %v567_v57 = vrot.slane %v528_v41, %v566_v22 }
 0x1e7   :  { %v442_v40 = vpop.xlane.xlu1 %441 }
 0x1e8   :  { %v482_v7 = vsub.f32 0.0, %v442_v40  ;;  %v529_v45 = vadd.f32 %v513_v34, %v497_v24  ;;  %v501_v58 = vmul.f32 0.95, %v373_v18  ;;  %v647_v18 = vadd.s32 4294967192, %v1088_v43 }
 0x1e9   :  { %v1221_v52 = vpop.xlane.xlu0 %341 }
 0x1ea   :  { %v514_v11 = vmul.f32 0.05, %v482_v7  ;;  %v374_v3 = vsub.f32 0.0, %v1221_v52  ;;  %v574_v0 = vrot.slane %v529_v45, %v573_v16 }
 0x1eb   :  { %v445_v53 = vpop.xlane.xlu1 %444 }
 0x1ec   :  { %v483_v55 = vsub.f32 0.0, %v445_v53  ;;  %v530_v47 = vadd.f32 %v514_v11, %v498_v62 }
 0x1ed   :  { %v1223_v28 = vpop.xlane.xlu0 %344 }
 0x1ee   :  { %v515_v37 = vmul.f32 0.05, %v483_v55  ;;  %v375_v7 = vsub.f32 0.0, %v1223_v28 }
 0x1ef   :  { %v448_v54 = vpop.xlane.xlu1 %447 }
 0x1f0   :  { %v484_v31 = vsub.f32 0.0, %v448_v54  ;;  %v531_v53 = vadd.f32 %v515_v37, %v499_v14  ;;  %v503_v50 = vmul.f32 0.95, %v375_v7 }
 0x1f1   :  { %v1225_v21 = vpop.xlane.xlu0 %347 }
 0x1f2   :  { %v516_v33 = vmul.f32 0.05, %v484_v31  ;;  %v588_v10 = vrot.slane %v531_v53, %v587_v44 }
 0x1f3   :  { %v451_v15 = vpop.xlane.xlu1 %450 }
 0x1f4   :  { %v485_v17 = vsub.f32 0.0, %v451_v15  ;;  %v1285_v15 = vadd.s32 4294967224, %v1088_v43  ;;  %v532_v4 = vadd.f32 %v516_v33, %v500_v46  ;;  %v633_v33 = vadd.s32 4294967208, %v1088_v43 }
 0x1f5   :  { %v1245_v27 = vpop.xlane.xlu0 %350 }
 0x1f6   :  { %v517_v54 = vmul.f32 0.05, %v485_v17  ;;  %v595_v16 = vrot.slane %v532_v4, %v594_v25  ;;  %v622_v34 = vsub.s32 %v1285_v15, %v1228_v30  ;;  %v377_v37 = vsub.f32 0.0, %v1245_v27 }
 0x1f7   :  { %v1253_v49 = vpop.xlane.xlu1 %453 }
 0x1f8   :  { %v486_v48 = vsub.f32 0.0, %v1253_v49  ;;  %v581_v49 = vrot.slane %v530_v47, %v580_v1  ;;  %v533_v19 = vadd.f32 %v517_v54, %v501_v58  ;;  %v654_v58 = vadd.s32 4294967184, %v1088_v43 }
 0x1f9   :  { %v1268_v5 = vpop.xlane.xlu0 %353 }
 0x1fa   :  { %v518_v8 = vmul.f32 0.05, %v486_v48  ;;  %v602_v59 = vrot.slane %v533_v19, %v601_v32  ;;  %v378_v32 = vsub.f32 0.0, %v1268_v5 }
 0x1fb   :  { %v457_v20 = vpop.xlane.xlu1 %456 }
 0x1fc   :  { %v487_v2 = vsub.f32 0.0, %v457_v20  ;;  %v376_v20 = vsub.f32 0.0, %v1225_v21  ;;  %v506_v15 = vmul.f32 0.95, %v378_v32 }
 0x1fd   :  { %v433_v35 = vpop.xlane.xlu0 %432 }
 0x1fe   :  { %v479_v36 = vsub.f32 0.0, %v433_v35  ;;  %v519_v28 = vmul.f32 0.05, %v487_v2  ;;  %v504_v11 = vmul.f32 0.95, %v376_v20 }
 0x1ff   :  { %v460_v39 = vpop.xlane.xlu1 %459 }
 0x200   :  { %v511_v42 = vmul.f32 0.05, %v479_v36  ;;  %v488_v31 = vsub.f32 0.0, %v460_v39  ;;  %v629_v36 = vsub.s32 %v1289_v12, %v1228_v30  ;;  %v535_v17 = vadd.f32 %v519_v28, %v503_v50 }
 0x201   :  { %v1281_v23 = vpop.xlane.xlu0 %356 }
 0x202   :  { %v527_v40 = vadd.f32 %v511_v42, %v495_v56  ;;  %v520_v21 = vmul.f32 0.05, %v488_v31  ;;  %v640_v42 = vadd.s32 4294967200, %v1088_v43  ;;  %v379_v45 = vsub.f32 0.0, %v1281_v23 }
 0x203   :  { %v463_v29 = vpop.xlane.xlu1 %462  ;;  %v616_v5 = vrot.slane %v535_v17, %v615_v26 }
 0x204   :  { %v562_v51 = vrot.slane %v527_v40, %v561_v9  ;;  %v502_v9 = vmul.f32 0.95, %v374_v3  ;;  %v489_v25 = vsub.f32 0.0, %v463_v29  ;;  %v536_v14 = vadd.f32 %v520_v21, %v504_v11 }
 0x205   :  { %v360_v52 = vpop.xlane.xlu0 %359  ;;  %v636_v29 = vsub.s32 %v633_v33, %v1228_v30  ;;  %v643_v23 = vsub.s32 %v640_v42, %v1228_v30  ;;  %v507_v4 = vmul.f32 0.95, %v379_v45 }
 0x206   :  { %v569_v55 = vsel %vm568_vm0, %v567_v57, %v562_v51  ;;  %v534_v44 = vadd.f32 %v518_v8, %v502_v9  ;;  %v521_v27 = vmul.f32 0.05, %v489_v25  ;;  %v380_v48 = vsub.f32 0.0, %v360_v52 }
 0x207   :  { %v576_v22 = vsel %vm575_vm2, %v574_v0, %v569_v55  ;;  %v466_v56 = vpop.xlane.xlu1 %465  ;;  %v623_v12 = vrot.slane %v536_v14, %v622_v34  ;;  %v650_v55 = vsub.s32 %v647_v18, %v1228_v30  ;;  %v657_v9 = vsub.s32 %v654_v58, %v1228_v30 }
 0x208   :  { %v583_v1 = vsel %vm582_vm3, %v581_v49, %v576_v22  ;;  %v490_v24 = vsub.f32 0.0, %v466_v56  ;;  %v609_v38 = vrot.slane %v534_v44, %v608_v6  ;;  %v505_v6 = vmul.f32 0.95, %v377_v37 }
 0x209   :  { %v590_v13 = vsel %vm589_vm4, %v588_v10, %v583_v1  ;;  %v363_v62 = vpop.xlane.xlu0 %362  ;;  %v508_v49 = vmul.f32 0.95, %v380_v48  ;;  %v661_v10 = vadd.s32 4294967176, %v1088_v43 }
 0x20a   :  { %v597_v35 = vsel %vm596_vm5, %v595_v16, %v590_v13  ;;  %v522_v40 = vmul.f32 0.05, %v490_v24  ;;  %v381_v53 = vsub.f32 0.0, %v363_v62  ;;  %v537_v51 = vadd.f32 %v521_v27, %v505_v6 }
 0x20b   :  { %v469_v61 = vpop.xlane.xlu1 %468  ;;  %v604_v39 = vsel %vm603_vm6, %v602_v59, %v597_v35  ;;  %v664_v43 = vsub.s32 %v661_v10, %v1228_v30 }
 0x20c   :  { %v491_v41 = vsub.f32 0.0, %v469_v61  ;;  %v611_v47 = vsel %vm610_vm7, %v609_v38, %v604_v39  ;;  %v538_v63 = vadd.f32 %v522_v40, %v506_v15  ;;  %v509_v7 = vmul.f32 0.95, %v381_v53 }
 0x20d   :  { %v618_v3 = vsel %vm617_vm8, %v616_v5, %v611_v47  ;;  %v366_v0 = vpop.xlane.xlu0 %365  ;;  %v630_v56 = vrot.slane %v537_v51, %v629_v36 }
 0x20e   :  { %v523_v54 = vmul.f32 0.05, %v491_v41  ;;  %v625_v19 = vsel %vm624_vm9, %v623_v12, %v618_v3  ;;  %v382_v22 = vsub.f32 0.0, %v366_v0  ;;  %v637_v20 = vrot.slane %v538_v63, %v636_v29 }
 0x20f   :  { %v472_v46 = vpop.xlane.xlu1 %471  ;;  %v632_v13 = vsel %vm631_vm10, %v630_v56, %v625_v19 }
 0x210   :  { %v492_v60 = vsub.f32 0.0, %v472_v46  ;;  %v539_v8 = vadd.f32 %v523_v54, %v507_v4  ;;  %v510_v34 = vmul.f32 0.95, %v382_v22  ;;  %v639_v21 = vsel %vm638_vm11, %v637_v20, %v632_v13 }
 0x212   :  { %v524_v57 = vmul.f32 0.05, %v492_v60  ;;  %v644_v44 = vrot.slane %v539_v8, %v643_v23 }
 0x213   :  { %v475_v2 = vpop.xlane.xlu1 %474 }
 0x214   :  { %v493_v26 = vsub.f32 0.0, %v475_v2  ;;  %v540_v31 = vadd.f32 %v524_v57, %v508_v49  ;;  %v646_v61 = vsel %vm645_vm12, %v644_v44, %v639_v21 }
 0x216   :  { %v525_v52 = vmul.f32 0.05, %v493_v26  ;;  %v651_v35 = vrot.slane %v540_v31, %v650_v55 }
 0x217   :  { %v478_v16 = vpop.xlane.xlu1 %477 }
 0x218   :  { %v541_v1 = vadd.f32 %v525_v52, %v509_v7  ;;  %v494_v28 = vsub.f32 0.0, %v478_v16  ;;  %v653_v36 = vsel %vm652_vm13, %v651_v35, %v646_v61 }
 0x21a   :  { %v526_v50 = vmul.f32 0.05, %v494_v28  ;;  %v658_v59 = vrot.slane %v541_v1, %v657_v9 }
 0x21c   :  { %v542_v25 = vadd.f32 %v526_v50, %v510_v34  ;;  %v660_v24 = vsel %vm659_vm14, %v658_v59, %v653_v36 }
 0x21e   :  { %v665_v11 = vrot.slane %v542_v25, %v664_v43 }
 0x220   :  { %v667_v37 = vsel %vm666_vm15, %v665_v11, %v660_v24 }
 0x221   :  { %669 = vst [vmem:[#allocation2] sm:$0x1] %v667_v37 }
 0x222   :  { %795 = shalt.err (!%p792_p4)
}
 0x223   :  { %s796_s20 = scalar_lea.hbm %s1346_s2, 16 }
 0x224   :  { %p797_p5 = scmp.ne.s32.totalorder %s1346_s2, %s796_s20  ;;  %p800_p6 = scmp.lt.u32.totalorder %s796_s20, %s1346_s2 }
 0x226   :  { %p802_p7 = pnand %p800_p6, %p797_p5 }
 0x228   :  { %805 = shalt.err (!%p802_p7)
}
 0x229   :  { %679 = dma.vmem_to_hbm [thread:$0]  %s677_s16, 16, %s1346_s2, [#allocation3]  }
 0x22a   :  { %806 = dma.done.wait [#allocation3], 16  }
 0x22b   :  { %807 = vsyncadd [#allocation3], 4294967280 }
 0x22c   :  { %683 = vsyncpa [#allocation3], 1 }

</bundles_post_ra>
